<compile_context>
chip_gen: v7x
topology: tpu7x:2x2x1
jax: 0.10.0
libtpu: 0.0.40
codegen_flags: <defaults>
</compile_context>

<pallas_src>
import jax
import jax.numpy as jnp
from jax.experimental import pallas as pl
from jax.experimental.pallas import tpu as pltpu


def _mlp_kernel(x_ref, w1_ref, b1_ref, w2_ref, b2_ref, o_ref):
    # Cast x -> bf16 in-kernel (VPU cast hides under MXU/DMA), f32 accumulation.
    x_bf16 = x_ref[...].astype(jnp.bfloat16)
    h = jnp.dot(x_bf16, w1_ref[...], preferred_element_type=jnp.float32)
    h = jnp.maximum(h + b1_ref[...], 0.0)          # b1 is [1, 256], broadcasts
    # fc2 (hidden cast back to bf16 for the MXU) + bias + sigmoid
    logits = jnp.dot(h.astype(jnp.bfloat16), w2_ref[...],
                     preferred_element_type=jnp.float32)
    logits = logits + b2_ref[...]                  # b2 is [1, 128] (padded)
    o_ref[...] = jax.nn.sigmoid(logits).astype(o_ref.dtype)


def _round_up(n, m):
    return ((n + m - 1) // m) * m


def light_estimator_forward(x, w1, b1, w2, b2, *, tb=None):
    """x: [B, dim_in] f32 (or bf16); w1: [dim_in, H]; b1: [H]; w2: [H, O]; b2: [O].

    Returns lights: [B, O] f32 == sigmoid(relu(x @ w1 + b1) @ w2 + b2).
    """
    B, dim_in = x.shape
    hidden = w1.shape[1]
    out_dim = w2.shape[1]

    # ---- tiling decisions -------------------------------------------------
    # Lane-dense output: pad the 11-wide output to a multiple of 128.
    out_pad = _round_up(out_dim, 128)
    # Batch tile: multiple of 128 for B > 128 (full MXU M-dim, amortizes the
    # ~0.35 us per-grid-step overhead), multiple of 16 for tiny batches.
    # Cap at 1024 rows and keep >= 2 grid steps for larger batches so v7x's
    # two TensorCores both get work via the "parallel" grid axis.
    if tb is None:
        if B <= 128:
            tb = _round_up(B, 16)
        else:
            tb = min(1024, _round_up(pl.cdiv(B, 2), 128))
    grid = (pl.cdiv(B, tb),)   # ragged last tile handled by Pallas, no x pad

    # ---- wrapper-side prep: weights/biases only (x is passed through) -----
    w1_bf16 = w1.astype(jnp.bfloat16)
    b1_2d = b1.reshape(1, hidden).astype(jnp.float32)
    w2_p = jnp.pad(w2, ((0, 0), (0, out_pad - out_dim))).astype(jnp.bfloat16)
    b2_p = jnp.pad(b2.reshape(1, out_dim),
                   ((0, 0), (0, out_pad - out_dim))).astype(jnp.float32)

    x_bytes = B * dim_in * x.dtype.itemsize
    cost = pl.CostEstimate(
        flops=2 * B * dim_in * hidden + 2 * B * hidden * out_pad,
        transcendentals=B * out_pad,
        bytes_accessed=(x_bytes + w1_bf16.size * 2 + w2_p.size * 2
                        + b1_2d.size * 4 + b2_p.size * 4 + B * out_pad * 4),
    )

    out_padded = pl.pallas_call(
        _mlp_kernel,
        out_shape=jax.ShapeDtypeStruct((B, out_pad), jnp.float32),
        grid_spec=pl.GridSpec(
            grid=grid,
            in_specs=[
                pl.BlockSpec((tb, dim_in), lambda i: (i, 0)),       # x tile
                pl.BlockSpec((dim_in, hidden), lambda i: (0, 0)),   # W1 (resident)
                pl.BlockSpec((1, hidden), lambda i: (0, 0)),        # b1
                pl.BlockSpec((hidden, out_pad), lambda i: (0, 0)),  # W2 (padded)
                pl.BlockSpec((1, out_pad), lambda i: (0, 0)),       # b2 (padded)
            ],
            out_specs=pl.BlockSpec((tb, out_pad), lambda i: (i, 0)),
        ),
        compiler_params=pltpu.CompilerParams(
            dimension_semantics=("parallel",),
            # tb=1024 f32 x tile (double-buffered) + weights + out ~= 18 MiB;
            # raise above v5e's 16 MiB scoped default, still far under
            # physical VMEM on all generations.
            vmem_limit_bytes=28 * 1024 * 1024,
        ),
        cost_estimate=cost,
    )(x, w1_bf16, b1_2d, w2_p, b2_p)

    # Slice away the padded output lanes (batch is never padded anymore).
    return out_padded[:, :out_dim]


if __name__ == "__main__":
    # Small, deterministic setup consistent with light_estimator(dim_in=1536).
    B = 12          # deliberately not a multiple of 8/16: exercises ragged tile
    dim_in = 1536
    hidden = 256
    out_dim = 11

    key = jax.random.PRNGKey(0)
    kx, kw1, kb1, kw2, kb2 = jax.random.split(key, 5)

    x = jax.random.normal(kx, (B, dim_in), dtype=jnp.float32)

    # Deterministic parameter init (uniform bounds like nn.Linear's default).
    bound1 = 1.0 / (dim_in ** 0.5)
    w1 = jax.random.uniform(kw1, (dim_in, hidden), jnp.float32, -bound1, bound1)
    b1 = jax.random.uniform(kb1, (hidden,), jnp.float32, -bound1, bound1)
    bound2 = 1.0 / (hidden ** 0.5)
    w2 = jax.random.uniform(kw2, (hidden, out_dim), jnp.float32, -bound2, bound2)
    b2 = jax.random.uniform(kb2, (out_dim,), jnp.float32, -bound2, bound2)

    lights = light_estimator_forward(x, w1, b1, w2, b2)
    lights = jax.block_until_ready(lights)

    # Reference check in plain JAX (same math as the torch module, f32).
    ref = jax.nn.sigmoid(jnp.maximum(x @ w1 + b1[None, :], 0.0) @ w2 + b2[None, :])
    assert lights.shape == (B, out_dim)
    # bf16 MXU inputs -> relaxed tolerance on sigmoid outputs.
    assert jnp.allclose(lights, ref, atol=2e-2, rtol=0.0), (
        float(jnp.max(jnp.abs(lights - ref))))

    print("KERNEL_OK")
</pallas_src>

<mosaic_0001>
module attributes {stable_mosaic.version = 11 : i64} {
  func.func @_mlp_kernel(%arg0: i32, %arg1: memref<16x1536xf32, #tpu.memory_space<vmem>>, %arg2: memref<1536x256xbf16, #tpu.memory_space<vmem>>, %arg3: memref<1x256xf32, #tpu.memory_space<vmem>>, %arg4: memref<256x128xbf16, #tpu.memory_space<vmem>>, %arg5: memref<1x128xf32, #tpu.memory_space<vmem>>, %arg6: memref<16x128xf32, #tpu.memory_space<vmem>>) attributes {dimension_semantics = [#tpu.dimension_semantics<parallel>], iteration_bounds = array<i64: 1>, scalar_prefetch = 0 : i64, scratch_operands = 0 : i64, tpu.core_type = #tpu.core_type<tc>, window_params = [{transform_indices = @transform_0, window_bounds = array<i64: 16, 1536>}, {pipeline_mode = #tpu.pipeline_mode<synchronous>, transform_indices = @transform_1, window_bounds = array<i64: 1536, 256>}, {pipeline_mode = #tpu.pipeline_mode<synchronous>, transform_indices = @transform_2, window_bounds = array<i64: 1, 256>}, {pipeline_mode = #tpu.pipeline_mode<synchronous>, transform_indices = @transform_3, window_bounds = array<i64: 256, 128>}, {pipeline_mode = #tpu.pipeline_mode<synchronous>, transform_indices = @transform_4, window_bounds = array<i64: 1, 128>}, {transform_indices = @transform_5, window_bounds = array<i64: 16, 128>}]} {
    %c0 = arith.constant 0 : index
    %c0_0 = arith.constant 0 : index
    %0 = vector.load %arg1[%c0, %c0_0] : memref<16x1536xf32, #tpu.memory_space<vmem>>, vector<16x1536xf32>
    %1 = arith.truncf %0 : vector<16x1536xf32> to vector<16x1536xbf16>
    %c0_1 = arith.constant 0 : index
    %c0_2 = arith.constant 0 : index
    %2 = vector.load %arg2[%c0_1, %c0_2] : memref<1536x256xbf16, #tpu.memory_space<vmem>>, vector<1536x256xbf16>
    %cst = arith.constant dense<0.000000e+00> : vector<16x256xf32>
    %3 = tpu.matmul %1, %2, %cst {dimension_numbers = #tpu.dot_dimension_numbers<[1], [0], [0], [1], [0, 0, 1, 1], [], []>} : vector<16x1536xbf16>, vector<1536x256xbf16>, vector<16x256xf32> -> vector<16x256xf32>
    %c0_3 = arith.constant 0 : index
    %c0_4 = arith.constant 0 : index
    %4 = vector.load %arg3[%c0_3, %c0_4] : memref<1x256xf32, #tpu.memory_space<vmem>>, vector<1x256xf32>
    %5 = vector.broadcast %4 : vector<1x256xf32> to vector<16x256xf32>
    %6 = arith.addf %3, %5 : vector<16x256xf32>
    %cst_5 = arith.constant 0.000000e+00 : f32
    %7 = vector.broadcast %cst_5 : f32 to vector<16x256xf32>
    %8 = arith.maximumf %6, %7 : vector<16x256xf32>
    %9 = arith.truncf %8 : vector<16x256xf32> to vector<16x256xbf16>
    %c0_6 = arith.constant 0 : index
    %c0_7 = arith.constant 0 : index
    %10 = vector.load %arg4[%c0_6, %c0_7] : memref<256x128xbf16, #tpu.memory_space<vmem>>, vector<256x128xbf16>
    %cst_8 = arith.constant dense<0.000000e+00> : vector<16x128xf32>
    %11 = tpu.matmul %9, %10, %cst_8 {dimension_numbers = #tpu.dot_dimension_numbers<[1], [0], [0], [1], [0, 0, 1, 1], [], []>} : vector<16x256xbf16>, vector<256x128xbf16>, vector<16x128xf32> -> vector<16x128xf32>
    %c0_9 = arith.constant 0 : index
    %c0_10 = arith.constant 0 : index
    %12 = vector.load %arg5[%c0_9, %c0_10] : memref<1x128xf32, #tpu.memory_space<vmem>>, vector<1x128xf32>
    %13 = vector.broadcast %12 : vector<1x128xf32> to vector<16x128xf32>
    %14 = arith.addf %11, %13 : vector<16x128xf32>
    %15 = arith.negf %14 : vector<16x128xf32>
    %16 = math.exp %15 : vector<16x128xf32>
    %cst_11 = arith.constant 1.000000e+00 : f32
    %17 = vector.broadcast %cst_11 : f32 to vector<16x128xf32>
    %18 = arith.addf %17, %16 : vector<16x128xf32>
    %19 = arith.divf %17, %18 : vector<16x128xf32>
    %c0_12 = arith.constant 0 : index
    %c0_13 = arith.constant 0 : index
    %20 = vector.load %arg6[%c0_12, %c0_13] : memref<16x128xf32, #tpu.memory_space<vmem>>, vector<16x128xf32>
    tpu.vector_store %arg6[%c0_12, %c0_13], %19 {strides = array<i32>} : memref<16x128xf32, #tpu.memory_space<vmem>>, vector<16x128xf32>,
    return
  }
  func.func @transform_0(%arg0: i32) -> (i32, i32) {
    %c0_i32 = arith.constant 0 : i32
    %c0_i32_0 = arith.constant 0 : i32
    return %arg0, %c0_i32 : i32, i32
  }
  func.func @transform_1(%arg0: i32) -> (i32, i32) {
    %c0_i32 = arith.constant 0 : i32
    %c0_i32_0 = arith.constant 0 : i32
    %c0_i32_1 = arith.constant 0 : i32
    return %c0_i32, %c0_i32_0 : i32, i32
  }
  func.func @transform_2(%arg0: i32) -> (i32, i32) {
    %c0_i32 = arith.constant 0 : i32
    %c0_i32_0 = arith.constant 0 : i32
    %c0_i32_1 = arith.constant 0 : i32
    return %c0_i32, %c0_i32_0 : i32, i32
  }
  func.func @transform_3(%arg0: i32) -> (i32, i32) {
    %c0_i32 = arith.constant 0 : i32
    %c0_i32_0 = arith.constant 0 : i32
    %c0_i32_1 = arith.constant 0 : i32
    return %c0_i32, %c0_i32_0 : i32, i32
  }
  func.func @transform_4(%arg0: i32) -> (i32, i32) {
    %c0_i32 = arith.constant 0 : i32
    %c0_i32_0 = arith.constant 0 : i32
    %c0_i32_1 = arith.constant 0 : i32
    return %c0_i32, %c0_i32_0 : i32, i32
  }
  func.func @transform_5(%arg0: i32) -> (i32, i32) {
    %c0_i32 = arith.constant 0 : i32
    %c0_i32_0 = arith.constant 0 : i32
    return %arg0, %c0_i32 : i32, i32
  }
}

</mosaic_0001>

<bundles_post_ra>
// kernel: tpu_custom_call.1
= control target key start
LH: loop header
LB: loop body
LE: loop exit
PB: predicated region body
PF: predicated region fallthrough
CT: control target
= control target key end

     0   :  { %10 = vsyncpa [#allocation3], 0  ;;  %s2508_s0 = inlined_call_operand.hbm [shape: f32[12,1536], index: 0, kind: input, shape index: {}]   ;;  %s2509_s1 = inlined_call_operand.hbm [shape: bf16[1536,256], index: 1, kind: input, shape index: {}]   ;;  %s2510_s2 = inlined_call_operand.vmem [shape: f32[1,256], index: 2, kind: input, shape index: {}]   ;;  %s2511_s3 = inlined_call_operand.hbm [shape: bf16[256,128], index: 3, kind: input, shape index: {}]   ;;  %s2512_s4 = inlined_call_operand.vmem [shape: f32[1,128], index: 4, kind: input, shape index: {}]   ;;  %s2513_s5 = inlined_call_operand.hbm [shape: f32[12,128], index: 5, kind: output, shape index: {}]  }
   0x1   :  { %11 = vsyncpa [#allocation6], 0 }
   0x2   :  { %12 = vsyncpa [#allocation4], 0  ;;  %s2408_s18 = smov [#allocation5]   ;;  %s2314_s22 = scalar_lea.hbm %s2509_s1, 24576 }
   0x3   :  { %s30_s19 = sshll.u32 %s2408_s18, 4  ;;  %p2315_p0 = scmp.ne.s32.totalorder %s2509_s1, %s2314_s22  ;;  %s31_s19 = int_to_ptr.vmem [resolvable:$true] %s30_s19 }
   0x4   :  { %p2318_p1 = scmp.lt.u32.totalorder %s2314_s22, %s2509_s1 }
   0x6   :  { %p2320_p2 = pnand %p2318_p1, %p2315_p0 }
   0x8   :  { %2323 = shalt.err (!%p2320_p2)
}
   0x9   :  { %s2324_s27 = scalar_lea.vmem %s31_s19, 24576  ;;  %p2329_p4 = scmp.lt.s32.totalorder %s31_s19, %s31_s19 }
   0xa   :  { %p2325_p3 = scmp.ne.s32.totalorder %s31_s19, %s2324_s27  ;;  %p2330_p5 = scmp.lt.s32.totalorder %s2324_s27, %s2324_s27 }
   0xc   :  { %p2331_p6 = por %p2330_p5, %p2329_p4 }
   0xe   :  { %p2332_p7 = pnand %p2331_p6, %p2325_p3 }
  0x10   :  { %2335 = shalt.err (!%p2332_p7)
}
  0x11   :  { %s2409_s28 = smov 128   ;;  %s2410_s29 = smov 8  }
  0x12   :  { %36 = dma.hbm_to_vmem [thread:$0]  %s2509_s1, 24576, %s31_s19, [#allocation6], %s2409_s28, %s2409_s28, %s2410_s29  }
  0x13   :  { %s2411_s7 = smov [#allocation2]   ;;  %s2336_s11 = scalar_lea.hbm %s2508_s0, 3072 }
  0x14   :  { %s18_s8 = sshll.u32 %s2411_s7, 4  ;;  %p2337_p8 = scmp.ne.s32.totalorder %s2508_s0, %s2336_s11  ;;  %s19_s8 = int_to_ptr.vmem [resolvable:$true] %s18_s8 }
  0x15   :  { %p2340_p9 = scmp.lt.u32.totalorder %s2336_s11, %s2508_s0 }
  0x17   :  { %p2342_p10 = pnand %p2340_p9, %p2337_p8 }
  0x19   :  { %2345 = shalt.err (!%p2342_p10)
}
  0x1a   :  { %s2346_s16 = scalar_lea.vmem %s19_s8, 3072  ;;  %p2351_p12 = scmp.lt.s32.totalorder %s19_s8, %s19_s8 }
  0x1b   :  { %p2347_p11 = scmp.ne.s32.totalorder %s19_s8, %s2346_s16  ;;  %p2352_p13 = scmp.lt.s32.totalorder %s2346_s16, %s2346_s16 }
  0x1d   :  { %p2353_p0 = por %p2352_p13, %p2351_p12 }
  0x1f   :  { %p2354_p1 = pnand %p2353_p0, %p2347_p11 }
  0x21   :  { %2357 = shalt.err (!%p2354_p1)
}
  0x22   :  { %s2412_s1 = smov 1536   ;;  %s2413_s17 = smov 96  }
  0x23   :  { %24 = dma.hbm_to_vmem [thread:$0]  %s2508_s0, 3072, %s19_s8, [#allocation3], %s2412_s1, %s2412_s1, %s2413_s17  }
  0x24   :  { %s2414_s20 = smov [#allocation7]   ;;  %s2358_s24 = scalar_lea.hbm %s2511_s3, 2048 }
  0x25   :  { %s44_s21 = sshll.u32 %s2414_s20, 4  ;;  %p2359_p2 = scmp.ne.s32.totalorder %s2511_s3, %s2358_s24  ;;  %s45_s21 = int_to_ptr.vmem [resolvable:$true] %s44_s21 }
  0x26   :  { %p2362_p3 = scmp.lt.u32.totalorder %s2358_s24, %s2511_s3 }
  0x28   :  { %p2364_p4 = pnand %p2362_p3, %p2359_p2 }
  0x2a   :  { %2367 = shalt.err (!%p2364_p4)
}
  0x2b   :  { %s2368_s6 = scalar_lea.vmem %s45_s21, 2048  ;;  %p2373_p6 = scmp.lt.s32.totalorder %s45_s21, %s45_s21 }
  0x2c   :  { %p2369_p5 = scmp.ne.s32.totalorder %s45_s21, %s2368_s6  ;;  %p2374_p7 = scmp.lt.s32.totalorder %s2368_s6, %s2368_s6 }
  0x2e   :  { %p2375_p8 = por %p2374_p7, %p2373_p6 }
  0x30   :  { %p2376_p9 = pnand %p2375_p8, %p2369_p5 }
  0x32   :  { %2379 = shalt.err (!%p2376_p9)
}
  0x33   :  { %s2415_s0 = smov 64   ;;  %s2416_s7 = smov 4  }
  0x34   :  { %50 = dma.hbm_to_vmem [thread:$0]  %s2511_s3, 2048, %s45_s21, [#allocation6], %s2415_s0, %s2415_s0, %s2416_s7  }
  0x35   :  { %2402 = dma.done.wait [#allocation3], 3072  }
  0x36   :  { %2403 = vsyncadd [#allocation3], 4294964224 }
  0x37   :  { %2404 = dma.done.wait [#allocation6], 26624  }
  0x38   :  { %2405 = vsyncadd [#allocation6], 4294940672  ;;  %v2002_v0 = vld [vmem:[#allocation5 + $0x4] ss:$8 sps:$4 sm:$0xff]   ;;  %v2006_v2 = vld [vmem:[#allocation5] ss:$8 sps:$4 sm:$0xff]  }
  0x39   :  { %v2004_v1 = vld [vmem:[#allocation5 + $0x304] ss:$8 sps:$4 sm:$0xff]   ;;  %1263 = vmatprep.subr.bf16.mxu1 %v2002_v0  ;;  %v2007_v3 = vld [vmem:[#allocation5 + $0x300] ss:$8 sps:$4 sm:$0xff]   ;;  %v2008_v4 = vld [vmem:[#allocation5 + $0x14] ss:$8 sps:$4 sm:$0xff]  }
  0x3a   :  { %1392 = vmatprep.subr.bf16.mxu0 %v2004_v1  ;;  %1264 = vmatpush1.bf16.msra.mxu1 %v2006_v2  ;;  %v2010_v5 = vld [vmem:[#allocation5 + $0x314] ss:$8 sps:$4 sm:$0xff]   ;;  %v2012_v6 = vld [vmem:[#allocation5 + $0x10] ss:$8 sps:$4 sm:$0xff]   ;;  %v2014_v8 = vld [vmem:[#allocation5 + $0x24] ss:$8 sps:$4 sm:$0xff]  }
  0x3b   :  { %1393 = vmatpush1.bf16.msra.mxu0 %v2007_v3  ;;  %1265 = vmatprep.subr.bf16.mxu1 %v2008_v4  ;;  %v2013_v7 = vld [vmem:[#allocation5 + $0x310] ss:$8 sps:$4 sm:$0xff]   ;;  %v2016_v9 = vld [vmem:[#allocation5 + $0x324] ss:$8 sps:$4 sm:$0xff]   ;;  %v2018_v10 = vld [vmem:[#allocation5 + $0x20] ss:$8 sps:$4 sm:$0xff]  }
  0x3c   :  { %1394 = vmatprep.subr.bf16.mxu0 %v2010_v5  ;;  %v2019_v11 = vld [vmem:[#allocation5 + $0x320] ss:$8 sps:$4 sm:$0xff]   ;;  %v2020_v12 = vld [vmem:[#allocation5 + $0x34] ss:$8 sps:$4 sm:$0xff]   ;;  %v2024_v14 = vld [vmem:[#allocation5 + $0x30] ss:$8 sps:$4 sm:$0xff]  }
  0x3d   :  { %v2022_v13 = vld [vmem:[#allocation5 + $0x334] ss:$8 sps:$4 sm:$0xff]   ;;  %v2025_v15 = vld [vmem:[#allocation5 + $0x330] ss:$8 sps:$4 sm:$0xff]   ;;  %v2026_v16 = vld [vmem:[#allocation5 + $0x44] ss:$8 sps:$4 sm:$0xff]  }
  0x3e   :  { %1266 = vmatpush1.bf16.msra.mxu1 %v2012_v6  ;;  %v2028_v17 = vld [vmem:[#allocation5 + $0x344] ss:$8 sps:$4 sm:$0xff]   ;;  %v2030_v18 = vld [vmem:[#allocation5 + $0x40] ss:$8 sps:$4 sm:$0xff]   ;;  %v2032_v20 = vld [vmem:[#allocation5 + $0x54] ss:$8 sps:$4 sm:$0xff]  }
  0x3f   :  { %1395 = vmatpush1.bf16.msra.mxu0 %v2013_v7  ;;  %1267 = vmatprep.subr.bf16.mxu1 %v2014_v8  ;;  %v2031_v19 = vld [vmem:[#allocation5 + $0x340] ss:$8 sps:$4 sm:$0xff]   ;;  %v2034_v21 = vld [vmem:[#allocation5 + $0x354] ss:$8 sps:$4 sm:$0xff]   ;;  %v2036_v22 = vld [vmem:[#allocation5 + $0x50] ss:$8 sps:$4 sm:$0xff]  }
  0x40   :  { %1396 = vmatprep.subr.bf16.mxu0 %v2016_v9  ;;  %v2037_v23 = vld [vmem:[#allocation5 + $0x350] ss:$8 sps:$4 sm:$0xff]   ;;  %v2038_v24 = vld [vmem:[#allocation5 + $0x64] ss:$8 sps:$4 sm:$0xff]   ;;  %v2042_v26 = vld [vmem:[#allocation5 + $0x60] ss:$8 sps:$4 sm:$0xff]  }
  0x41   :  { %v2040_v25 = vld [vmem:[#allocation5 + $0x364] ss:$8 sps:$4 sm:$0xff]   ;;  %v2043_v27 = vld [vmem:[#allocation5 + $0x360] ss:$8 sps:$4 sm:$0xff]   ;;  %v2044_v28 = vld [vmem:[#allocation5 + $0x74] ss:$8 sps:$4 sm:$0xff]  }
  0x42   :  { %1268 = vmatpush1.bf16.msra.mxu1 %v2018_v10  ;;  %v2046_v29 = vld [vmem:[#allocation5 + $0x374] ss:$8 sps:$4 sm:$0xff]   ;;  %v2048_v30 = vld [vmem:[#allocation5 + $0x70] ss:$8 sps:$4 sm:$0xff]   ;;  %v2050_v32 = vld [vmem:[#allocation5 + $0x84] ss:$8 sps:$4 sm:$0xff]  }
  0x43   :  { %1397 = vmatpush1.bf16.msra.mxu0 %v2019_v11  ;;  %1269 = vmatprep.subr.bf16.mxu1 %v2020_v12  ;;  %v2049_v31 = vld [vmem:[#allocation5 + $0x370] ss:$8 sps:$4 sm:$0xff]   ;;  %v2052_v33 = vld [vmem:[#allocation5 + $0x384] ss:$8 sps:$4 sm:$0xff]   ;;  %v2054_v34 = vld [vmem:[#allocation5 + $0x80] ss:$8 sps:$4 sm:$0xff]  }
  0x44   :  { %1398 = vmatprep.subr.bf16.mxu0 %v2022_v13  ;;  %v2055_v35 = vld [vmem:[#allocation5 + $0x380] ss:$8 sps:$4 sm:$0xff]   ;;  %v2056_v36 = vld [vmem:[#allocation5 + $0x94] ss:$8 sps:$4 sm:$0xff]   ;;  %v2060_v38 = vld [vmem:[#allocation5 + $0x90] ss:$8 sps:$4 sm:$0xff]  }
  0x45   :  { %v2058_v37 = vld [vmem:[#allocation5 + $0x394] ss:$8 sps:$4 sm:$0xff]   ;;  %v2061_v39 = vld [vmem:[#allocation5 + $0x390] ss:$8 sps:$4 sm:$0xff]   ;;  %v2062_v40 = vld [vmem:[#allocation5 + $0xa4] ss:$8 sps:$4 sm:$0xff]  }
  0x46   :  { %1270 = vmatpush1.bf16.msra.mxu1 %v2024_v14  ;;  %v2064_v41 = vld [vmem:[#allocation5 + $0x3a4] ss:$8 sps:$4 sm:$0xff]   ;;  %v2066_v42 = vld [vmem:[#allocation5 + $0xa0] ss:$8 sps:$4 sm:$0xff]   ;;  %v2068_v44 = vld [vmem:[#allocation5 + $0xb4] ss:$8 sps:$4 sm:$0xff]  }
  0x47   :  { %1399 = vmatpush1.bf16.msra.mxu0 %v2025_v15  ;;  %1271 = vmatprep.subr.bf16.mxu1 %v2026_v16  ;;  %v2067_v43 = vld [vmem:[#allocation5 + $0x3a0] ss:$8 sps:$4 sm:$0xff]   ;;  %v2070_v45 = vld [vmem:[#allocation5 + $0x3b4] ss:$8 sps:$4 sm:$0xff]   ;;  %v2072_v46 = vld [vmem:[#allocation5 + $0xb0] ss:$8 sps:$4 sm:$0xff]  }
  0x48   :  { %1400 = vmatprep.subr.bf16.mxu0 %v2028_v17  ;;  %v2073_v47 = vld [vmem:[#allocation5 + $0x3b0] ss:$8 sps:$4 sm:$0xff]   ;;  %v64_v48 = vld [vmem:[#allocation2 + $0x8] sm:$0xff]  ;;  %v2080_v58 = vld [vmem:[#allocation5 + $0xd4] ss:$8 sps:$4 sm:$0xff]   ;;  %s2417_s12 = smov [#allocation8]  }
  0x49   :  { %v76_v49 = vld [vmem:[#allocation2 + $0x68] sm:$0xff]  ;;  %v70_v53 = vld [vmem:[#allocation2 + $0x38] sm:$0xff]  ;;  %v63_v6 = vld [vmem:[#allocation2] sm:$0xff]  ;;  %s1722_s13 = sshll.u32 %s2417_s12, 4  ;;  %s1723_s13 = int_to_ptr.vmem [resolvable:$true] %s1722_s13 }
  0x4a   :  { %1272 = vmatpush1.bf16.msra.mxu1 %v2030_v18  ;;  %v2074_v50 = vld [vmem:[#allocation5 + $0xc4] ss:$8 sps:$4 sm:$0xff]   ;;  %v88_v52 = vpack.c.bf16 %v76_v49, %v64_v48  ;;  %v82_v54 = vld [vmem:[#allocation2 + $0x98] sm:$0xff]  ;;  %v2078_v56 = vld [vmem:[#allocation5 + $0xc0] ss:$8 sps:$4 sm:$0xff]   ;;  %p2385_p11 = scmp.lt.s32.totalorder %s1723_s13, %s1723_s13 }
  0x4b   :  { %1401 = vmatpush1.bf16.msra.mxu0 %v2031_v19  ;;  %1273 = vmatprep.subr.bf16.mxu1 %v2032_v20  ;;  %v2076_v51 = vld [vmem:[#allocation5 + $0x3c4] ss:$8 sps:$4 sm:$0xff]   ;;  %v94_v55 = vpack.c.bf16 %v82_v54, %v70_v53  ;;  %v2079_v57 = vld [vmem:[#allocation5 + $0x3c0] ss:$8 sps:$4 sm:$0xff]   ;;  %v2082_v59 = vld [vmem:[#allocation5 + $0x3d4] ss:$8 sps:$4 sm:$0xff]  }
  0x4c   :  { %1402 = vmatprep.subr.bf16.mxu0 %v2034_v21  ;;  %1295 = vmatprep.mubr.bf16.mxu1 %v88_v52  ;;  %v2084_v60 = vld [vmem:[#allocation5 + $0xd0] ss:$8 sps:$4 sm:$0xff]   ;;  %v2086_v62 = vld [vmem:[#allocation5 + $0xe4] ss:$8 sps:$4 sm:$0xff]   ;;  %v2090_v0 = vld [vmem:[#allocation5 + $0xe0] ss:$8 sps:$4 sm:$0xff]  }
  0x4d   :  { %1424 = vmatprep.mubr.bf16.mxu0 %v94_v55  ;;  %v2085_v61 = vld [vmem:[#allocation5 + $0x3d0] ss:$8 sps:$4 sm:$0xff]   ;;  %v2088_v63 = vld [vmem:[#allocation5 + $0x3e4] ss:$8 sps:$4 sm:$0xff]   ;;  %v2091_v1 = vld [vmem:[#allocation5 + $0x3e0] ss:$8 sps:$4 sm:$0xff]  }
  0x4e   :  { %1274 = vmatpush1.bf16.msra.mxu1 %v2036_v22  ;;  %v2092_v2 = vld [vmem:[#allocation5 + $0xf4] ss:$8 sps:$4 sm:$0xff]   ;;  %v2096_v4 = vld [vmem:[#allocation5 + $0xf0] ss:$8 sps:$4 sm:$0xff]   ;;  %v2100_v7 = vld [vmem:[#allocation5 + $0x104] ss:$8 sps:$4 sm:$0xff]  }
  0x4f   :  { %1403 = vmatpush1.bf16.msra.mxu0 %v2037_v23  ;;  %1275 = vmatprep.subr.bf16.mxu1 %v2038_v24  ;;  %v2094_v3 = vld [vmem:[#allocation5 + $0x3f4] ss:$8 sps:$4 sm:$0xff]   ;;  %v2097_v5 = vld [vmem:[#allocation5 + $0x3f0] ss:$8 sps:$4 sm:$0xff]   ;;  %v75_v8 = vld [vmem:[#allocation2 + $0x60] sm:$0xff] }
  0x50   :  { %1404 = vmatprep.subr.bf16.mxu0 %v2040_v25  ;;  %v69_v9 = vld [vmem:[#allocation2 + $0x30] sm:$0xff]  ;;  %v2103_v11 = vld [vmem:[#allocation5 + $0x404] ss:$8 sps:$4 sm:$0xff]   ;;  %v2098_v12 = vld [vmem:[#allocation5 + $0x100] ss:$8 sps:$4 sm:$0xff]   ;;  %v87_v14 = vpack.c.bf16 %v75_v8, %v63_v6 }
  0x51   :  { %v81_v10 = vld [vmem:[#allocation2 + $0x90] sm:$0xff]  ;;  %v2101_v13 = vld [vmem:[#allocation5 + $0x400] ss:$8 sps:$4 sm:$0xff]   ;;  %v2112_v20 = vld [vmem:[#allocation5 + $0x124] ss:$8 sps:$4 sm:$0xff]  }
  0x52   :  { %1276 = vmatpush1.bf16.msra.mxu1 %v2042_v26  ;;  %v93_v15 = vpack.c.bf16 %v81_v10, %v69_v9  ;;  %v2106_v16 = vld [vmem:[#allocation5 + $0x114] ss:$8 sps:$4 sm:$0xff]   ;;  %v2104_v18 = vld [vmem:[#allocation5 + $0x110] ss:$8 sps:$4 sm:$0xff]   ;;  %v2115_v21 = vld [vmem:[#allocation5 + $0x424] ss:$8 sps:$4 sm:$0xff]  }
  0x53   :  { %1405 = vmatpush1.bf16.msra.mxu0 %v2043_v27  ;;  %1277 = vmatprep.subr.bf16.mxu1 %v2044_v28  ;;  %v2109_v17 = vld [vmem:[#allocation5 + $0x414] ss:$8 sps:$4 sm:$0xff]   ;;  %v2107_v19 = vld [vmem:[#allocation5 + $0x410] ss:$8 sps:$4 sm:$0xff]   ;;  %v2110_v22 = vld [vmem:[#allocation5 + $0x120] ss:$8 sps:$4 sm:$0xff]  }
  0x54   :  { %1406 = vmatprep.subr.bf16.mxu0 %v2046_v29  ;;  %v2113_v23 = vld [vmem:[#allocation5 + $0x420] ss:$8 sps:$4 sm:$0xff]   ;;  %v2118_v24 = vld [vmem:[#allocation5 + $0x134] ss:$8 sps:$4 sm:$0xff]   ;;  %v2116_v26 = vld [vmem:[#allocation5 + $0x130] ss:$8 sps:$4 sm:$0xff]  }
  0x55   :  { %v2121_v25 = vld [vmem:[#allocation5 + $0x434] ss:$8 sps:$4 sm:$0xff]   ;;  %v2119_v27 = vld [vmem:[#allocation5 + $0x430] ss:$8 sps:$4 sm:$0xff]   ;;  %v2124_v28 = vld [vmem:[#allocation5 + $0x144] ss:$8 sps:$4 sm:$0xff]  }
  0x56   :  { %1278 = vmatpush1.bf16.msra.mxu1 %v2048_v30  ;;  %v2127_v29 = vld [vmem:[#allocation5 + $0x444] ss:$8 sps:$4 sm:$0xff]   ;;  %v2122_v30 = vld [vmem:[#allocation5 + $0x140] ss:$8 sps:$4 sm:$0xff]   ;;  %v2140_v48 = vld [vmem:[#allocation5 + $0x170] ss:$8 sps:$4 sm:$0xff]  }
  0x57   :  { %1407 = vmatpush1.bf16.msra.mxu0 %v2049_v31  ;;  %1279 = vmatprep.subr.bf16.mxu1 %v2050_v32  ;;  %v2125_v31 = vld [vmem:[#allocation5 + $0x440] ss:$8 sps:$4 sm:$0xff]   ;;  %v2130_v32 = vld [vmem:[#allocation5 + $0x154] ss:$8 sps:$4 sm:$0xff]   ;;  %v2143_v49 = vld [vmem:[#allocation5 + $0x470] ss:$8 sps:$4 sm:$0xff]  }
  0x58   :  { %1408 = vmatprep.subr.bf16.mxu0 %v2052_v33  ;;  %v2133_v33 = vld [vmem:[#allocation5 + $0x454] ss:$8 sps:$4 sm:$0xff]   ;;  %v2146_v52 = vld [vmem:[#allocation5 + $0x180] ss:$8 sps:$4 sm:$0xff]   ;;  %v2176_v8 = vld [vmem:[#allocation5 + $0x1d0] ss:$8 sps:$4 sm:$0xff]  }
  0x59   :  { %v2149_v53 = vld [vmem:[#allocation5 + $0x480] ss:$8 sps:$4 sm:$0xff]   ;;  %v2154_v54 = vld [vmem:[#allocation5 + $0x194] ss:$8 sps:$4 sm:$0xff]   ;;  %v2179_v9 = vld [vmem:[#allocation5 + $0x4d0] ss:$8 sps:$4 sm:$0xff]  }
  0x5a   :  { %1280 = vmatpush1.bf16.msra.mxu1 %v2054_v34  ;;  %v2128_v34 = vld [vmem:[#allocation5 + $0x150] ss:$8 sps:$4 sm:$0xff]   ;;  %v2157_v55 = vld [vmem:[#allocation5 + $0x494] ss:$8 sps:$4 sm:$0xff]   ;;  %v2184_v10 = vld [vmem:[#allocation5 + $0x1e4] ss:$8 sps:$4 sm:$0xff]  }
  0x5b   :  { %1409 = vmatpush1.bf16.msra.mxu0 %v2055_v35  ;;  %1281 = vmatprep.subr.bf16.mxu1 %v2056_v36  ;;  %v2131_v35 = vld [vmem:[#allocation5 + $0x450] ss:$8 sps:$4 sm:$0xff]   ;;  %v2136_v36 = vld [vmem:[#allocation5 + $0x164] ss:$8 sps:$4 sm:$0xff]   ;;  %v2178_v6 = vld [vmem:[#allocation5 + $0x1d4] ss:$8 sps:$4 sm:$0xff]  }
  0x5c   :  { %1410 = vmatprep.subr.bf16.mxu0 %v2058_v37  ;;  %v2139_v37 = vld [vmem:[#allocation5 + $0x464] ss:$8 sps:$4 sm:$0xff]  }
  0x5e   :  { %1282 = vmatpush1.bf16.msra.mxu1 %v2060_v38  ;;  %v2134_v38 = vld [vmem:[#allocation5 + $0x160] ss:$8 sps:$4 sm:$0xff]  }
  0x5f   :  { %1411 = vmatpush1.bf16.msra.mxu0 %v2061_v39  ;;  %1283 = vmatprep.subr.bf16.mxu1 %v2062_v40  ;;  %v2137_v39 = vld [vmem:[#allocation5 + $0x460] ss:$8 sps:$4 sm:$0xff]   ;;  %v66_v40 = vld [vmem:[#allocation2 + $0x18] sm:$0xff] }
  0x60   :  { %1412 = vmatprep.subr.bf16.mxu0 %v2064_v41  ;;  %v78_v41 = vld [vmem:[#allocation2 + $0x78] sm:$0xff] }
  0x62   :  { %1284 = vmatpush1.bf16.msra.mxu1 %v2066_v42  ;;  %v2142_v42 = vld [vmem:[#allocation5 + $0x174] ss:$8 sps:$4 sm:$0xff]  }
  0x63   :  { %1413 = vmatpush1.bf16.msra.mxu0 %v2067_v43  ;;  %1285 = vmatprep.subr.bf16.mxu1 %v2068_v44  ;;  %v2145_v43 = vld [vmem:[#allocation5 + $0x474] ss:$8 sps:$4 sm:$0xff]   ;;  %v90_v44 = vpack.c.bf16 %v78_v41, %v66_v40  ;;  %v2209_v40 = vld [vmem:[#allocation5 + $0x520] ss:$8 sps:$4 sm:$0xff]  }
  0x64   :  { %1414 = vmatprep.subr.bf16.mxu0 %v2070_v45  ;;  %v72_v45 = vld [vmem:[#allocation2 + $0x48] sm:$0xff] }
  0x66   :  { %1286 = vmatpush1.bf16.msra.mxu1 %v2072_v46  ;;  %v84_v46 = vld [vmem:[#allocation2 + $0xa8] sm:$0xff] }
  0x67   :  { %1415 = vmatpush1.bf16.msra.mxu0 %v2073_v47  ;;  %1287 = vmatprep.subr.bf16.mxu1 %v2074_v50  ;;  %v96_v47 = vpack.c.bf16 %v84_v46, %v72_v45  ;;  %v2148_v50 = vld [vmem:[#allocation5 + $0x184] ss:$8 sps:$4 sm:$0xff]   ;;  %v2215_v45 = vld [vmem:[#allocation5 + $0x530] ss:$8 sps:$4 sm:$0xff]  }
  0x68   :  { %1416 = vmatprep.subr.bf16.mxu0 %v2076_v51  ;;  %v2151_v51 = vld [vmem:[#allocation5 + $0x484] ss:$8 sps:$4 sm:$0xff]  }
  0x69   :  { %v2220_v46 = vld [vmem:[#allocation5 + $0x244] ss:$8 sps:$4 sm:$0xff]  }
  0x6a   :  { %1288 = vmatpush1.bf16.msra.mxu1 %v2078_v56  ;;  %v2152_v56 = vld [vmem:[#allocation5 + $0x190] ss:$8 sps:$4 sm:$0xff]  }
  0x6b   :  { %1417 = vmatpush1.bf16.msra.mxu0 %v2079_v57  ;;  %1289 = vmatprep.subr.bf16.mxu1 %v2080_v58  ;;  %v2155_v57 = vld [vmem:[#allocation5 + $0x490] ss:$8 sps:$4 sm:$0xff]   ;;  %v2160_v58 = vld [vmem:[#allocation5 + $0x1a4] ss:$8 sps:$4 sm:$0xff]  }
  0x6c   :  { %1418 = vmatprep.subr.bf16.mxu0 %v2082_v59  ;;  %v2163_v59 = vld [vmem:[#allocation5 + $0x4a4] ss:$8 sps:$4 sm:$0xff]  }
  0x6e   :  { %1290 = vmatpush1.bf16.msra.mxu1 %v2084_v60  ;;  %v2158_v60 = vld [vmem:[#allocation5 + $0x1a0] ss:$8 sps:$4 sm:$0xff]  }
  0x6f   :  { %1419 = vmatpush1.bf16.msra.mxu0 %v2085_v61  ;;  %1291 = vmatprep.subr.bf16.mxu1 %v2086_v62  ;;  %v2161_v61 = vld [vmem:[#allocation5 + $0x4a0] ss:$8 sps:$4 sm:$0xff]   ;;  %v2166_v62 = vld [vmem:[#allocation5 + $0x1b4] ss:$8 sps:$4 sm:$0xff]  }
  0x70   :  { %1420 = vmatprep.subr.bf16.mxu0 %v2088_v63  ;;  %v2169_v63 = vld [vmem:[#allocation5 + $0x4b4] ss:$8 sps:$4 sm:$0xff]  }
  0x72   :  { %1292 = vmatpush1.bf16.msra.mxu1 %v2090_v0  ;;  %v2164_v0 = vld [vmem:[#allocation5 + $0x1b0] ss:$8 sps:$4 sm:$0xff]  }
  0x73   :  { %1421 = vmatpush1.bf16.msra.mxu0 %v2091_v1  ;;  %1293 = vmatprep.subr.bf16.mxu1 %v2092_v2  ;;  %v2167_v1 = vld [vmem:[#allocation5 + $0x4b0] ss:$8 sps:$4 sm:$0xff]   ;;  %v2172_v2 = vld [vmem:[#allocation5 + $0x1c4] ss:$8 sps:$4 sm:$0xff]  }
  0x74   :  { %1422 = vmatprep.subr.bf16.mxu0 %v2094_v3  ;;  %v2175_v3 = vld [vmem:[#allocation5 + $0x4c4] ss:$8 sps:$4 sm:$0xff]  }
  0x76   :  { %1294 = vmatpush1.bf16.msra.mxu1 %v2096_v4  ;;  %v2170_v4 = vld [vmem:[#allocation5 + $0x1c0] ss:$8 sps:$4 sm:$0xff]  }
  0x77   :  { %1423 = vmatpush1.bf16.msra.mxu0 %v2097_v5  ;;  %1306 = vmatprep.subr.bf16.mxu1 %v2100_v7  ;;  %v2173_v5 = vld [vmem:[#allocation5 + $0x4c0] ss:$8 sps:$4 sm:$0xff]   ;;  %v2181_v7 = vld [vmem:[#allocation5 + $0x4d4] ss:$8 sps:$4 sm:$0xff]  }
  0x78   :  { %1435 = vmatprep.subr.bf16.mxu0 %v2103_v11  ;;  %v2187_v11 = vld [vmem:[#allocation5 + $0x4e4] ss:$8 sps:$4 sm:$0xff]  }
  0x79   :  { %1296 = vmatmul.mubr.bf16.vlgmr.msra.gmra.mrb[0].mxu1 %v87_v14  ;;  %v2190_v14 = vld [vmem:[#allocation5 + $0x1f4] ss:$8 sps:$4 sm:$0xff]  }
  0x7a   :  { %1425 = vmatmul.mubr.bf16.vlgmr.msra.gmra.mrb[0].mxu0 %v93_v15  ;;  %1307 = vmatpush1.bf16.msra.mxu1 %v2098_v12  ;;  %v2182_v12 = vld [vmem:[#allocation5 + $0x1e0] ss:$8 sps:$4 sm:$0xff]   ;;  %v2193_v15 = vld [vmem:[#allocation5 + $0x4f4] ss:$8 sps:$4 sm:$0xff]  }
  0x7b   :  { %1436 = vmatpush1.bf16.msra.mxu0 %v2101_v13  ;;  %1308 = vmatprep.subr.bf16.mxu1 %v2106_v16  ;;  %v2185_v13 = vld [vmem:[#allocation5 + $0x4e0] ss:$8 sps:$4 sm:$0xff]   ;;  %v2188_v16 = vld [vmem:[#allocation5 + $0x1f0] ss:$8 sps:$4 sm:$0xff]  }
  0x7c   :  { %1437 = vmatprep.subr.bf16.mxu0 %v2109_v17  ;;  %1338 = vmatprep.mubr.bf16.mxu1 %v90_v44  ;;  %v2191_v17 = vld [vmem:[#allocation5 + $0x4f0] ss:$8 sps:$4 sm:$0xff]  }
  0x7d   :  { %1467 = vmatprep.mubr.bf16.mxu0 %v96_v47  ;;  %v2212_v44 = vld [vmem:[#allocation5 + $0x230] ss:$8 sps:$4 sm:$0xff]   ;;  %v2223_v47 = vld [vmem:[#allocation5 + $0x544] ss:$8 sps:$4 sm:$0xff]  }
  0x7e   :  { %1309 = vmatpush1.bf16.msra.mxu1 %v2104_v18  ;;  %v65_v18 = vld [vmem:[#allocation2 + $0x10] sm:$0xff] }
  0x7f   :  { %1438 = vmatpush1.bf16.msra.mxu0 %v2107_v19  ;;  %1310 = vmatprep.subr.bf16.mxu1 %v2112_v20  ;;  %v2196_v19 = vld [vmem:[#allocation5 + $0x204] ss:$8 sps:$4 sm:$0xff]   ;;  %v77_v20 = vld [vmem:[#allocation2 + $0x70] sm:$0xff] }
  0x80   :  { %1439 = vmatprep.subr.bf16.mxu0 %v2115_v21  ;;  %v71_v21 = vld [vmem:[#allocation2 + $0x40] sm:$0xff] }
  0x82   :  { %1311 = vmatpush1.bf16.msra.mxu1 %v2110_v22  ;;  %v83_v22 = vld [vmem:[#allocation2 + $0xa0] sm:$0xff] }
  0x83   :  { %1440 = vmatpush1.bf16.msra.mxu0 %v2113_v23  ;;  %1312 = vmatprep.subr.bf16.mxu1 %v2118_v24  ;;  %v2199_v23 = vld [vmem:[#allocation5 + $0x504] ss:$8 sps:$4 sm:$0xff]   ;;  %v2194_v24 = vld [vmem:[#allocation5 + $0x200] ss:$8 sps:$4 sm:$0xff]  }
  0x84   :  { %1441 = vmatprep.subr.bf16.mxu0 %v2121_v25  ;;  %v2197_v25 = vld [vmem:[#allocation5 + $0x500] ss:$8 sps:$4 sm:$0xff]  }
  0x86   :  { %1313 = vmatpush1.bf16.msra.mxu1 %v2116_v26  ;;  %v89_v26 = vpack.c.bf16 %v77_v20, %v65_v18  ;;  %v2274_v18 = vld [vmem:[#allocation5 + $0x2d4] ss:$8 sps:$4 sm:$0xff]   ;;  %v2272_v20 = vld [vmem:[#allocation5 + $0x2d0] ss:$8 sps:$4 sm:$0xff]  }
  0x87   :  { %1442 = vmatpush1.bf16.msra.mxu0 %v2119_v27  ;;  %1314 = vmatprep.subr.bf16.mxu1 %v2124_v28  ;;  %v95_v27 = vpack.c.bf16 %v83_v22, %v71_v21  ;;  %v2202_v28 = vld [vmem:[#allocation5 + $0x214] ss:$8 sps:$4 sm:$0xff]   ;;  %v2275_v21 = vld [vmem:[#allocation5 + $0x5d0] ss:$8 sps:$4 sm:$0xff]   ;;  %v2280_v22 = vld [vmem:[#allocation5 + $0x2e4] ss:$8 sps:$4 sm:$0xff]  }
  0x88   :  { %1443 = vmatprep.subr.bf16.mxu0 %v2127_v29  ;;  %v2205_v29 = vld [vmem:[#allocation5 + $0x514] ss:$8 sps:$4 sm:$0xff]  }
  0x8a   :  { %1315 = vmatpush1.bf16.msra.mxu1 %v2122_v30  ;;  %v2200_v30 = vld [vmem:[#allocation5 + $0x210] ss:$8 sps:$4 sm:$0xff]  }
  0x8b   :  { %1444 = vmatpush1.bf16.msra.mxu0 %v2125_v31  ;;  %1316 = vmatprep.subr.bf16.mxu1 %v2130_v32  ;;  %v2203_v31 = vld [vmem:[#allocation5 + $0x510] ss:$8 sps:$4 sm:$0xff]   ;;  %v2208_v32 = vld [vmem:[#allocation5 + $0x224] ss:$8 sps:$4 sm:$0xff]  }
  0x8c   :  { %1445 = vmatprep.subr.bf16.mxu0 %v2133_v33  ;;  %v2211_v33 = vld [vmem:[#allocation5 + $0x524] ss:$8 sps:$4 sm:$0xff]  }
  0x8e   :  { %1317 = vmatpush1.bf16.msra.mxu1 %v2128_v34  ;;  %v68_v34 = vld [vmem:[#allocation2 + $0x28] sm:$0xff] }
  0x8f   :  { %1446 = vmatpush1.bf16.msra.mxu0 %v2131_v35  ;;  %1318 = vmatprep.subr.bf16.mxu1 %v2136_v36  ;;  %v80_v35 = vld [vmem:[#allocation2 + $0x88] sm:$0xff] }
  0x90   :  { %1447 = vmatprep.subr.bf16.mxu0 %v2139_v37  ;;  %v92_v36 = vpack.c.bf16 %v80_v35, %v68_v34  ;;  %v74_v37 = vld [vmem:[#allocation2 + $0x58] sm:$0xff]  ;;  %v2290_v34 = vld [vmem:[#allocation7 + $0x40] sm:$0xff]  }
  0x92   :  { %1319 = vmatpush1.bf16.msra.mxu1 %v2134_v38  ;;  %v86_v38 = vld [vmem:[#allocation2 + $0xb8] sm:$0xff] }
  0x93   :  { %1448 = vmatpush1.bf16.msra.mxu0 %v2137_v39  ;;  %1320 = vmatprep.subr.bf16.mxu1 %v2142_v42  ;;  %v2206_v39 = vld [vmem:[#allocation5 + $0x220] ss:$8 sps:$4 sm:$0xff]   ;;  %v98_v41 = vpack.c.bf16 %v86_v38, %v74_v37  ;;  %v2214_v42 = vld [vmem:[#allocation5 + $0x234] ss:$8 sps:$4 sm:$0xff]  }
  0x94   :  { %1449 = vmatprep.subr.bf16.mxu0 %v2145_v43  ;;  %v2217_v43 = vld [vmem:[#allocation5 + $0x534] ss:$8 sps:$4 sm:$0xff]   ;;  %v2291_v37 = vld [vmem:[#allocation7] sm:$0xff]   ;;  %v2292_v38 = vld [vmem:[#allocation7 + $0x48] sm:$0xff]  }
  0x96   :  { %1321 = vmatpush1.bf16.msra.mxu1 %v2140_v48  ;;  %v2218_v48 = vld [vmem:[#allocation5 + $0x240] ss:$8 sps:$4 sm:$0xff]  }
  0x97   :  { %1450 = vmatpush1.bf16.msra.mxu0 %v2143_v49  ;;  %1322 = vmatprep.subr.bf16.mxu1 %v2148_v50  ;;  %v2221_v49 = vld [vmem:[#allocation5 + $0x540] ss:$8 sps:$4 sm:$0xff]   ;;  %v2226_v50 = vld [vmem:[#allocation5 + $0x254] ss:$8 sps:$4 sm:$0xff]  }
  0x98   :  { %1451 = vmatprep.subr.bf16.mxu0 %v2151_v51  ;;  %v2229_v51 = vld [vmem:[#allocation5 + $0x554] ss:$8 sps:$4 sm:$0xff]  }
  0x9a   :  { %1323 = vmatpush1.bf16.msra.mxu1 %v2146_v52  ;;  %v2224_v52 = vld [vmem:[#allocation5 + $0x250] ss:$8 sps:$4 sm:$0xff]  }
  0x9b   :  { %1452 = vmatpush1.bf16.msra.mxu0 %v2149_v53  ;;  %1324 = vmatprep.subr.bf16.mxu1 %v2154_v54  ;;  %v2227_v53 = vld [vmem:[#allocation5 + $0x550] ss:$8 sps:$4 sm:$0xff]   ;;  %v2232_v54 = vld [vmem:[#allocation5 + $0x264] ss:$8 sps:$4 sm:$0xff]  }
  0x9c   :  { %1453 = vmatprep.subr.bf16.mxu0 %v2157_v55  ;;  %v2235_v55 = vld [vmem:[#allocation5 + $0x564] ss:$8 sps:$4 sm:$0xff]  }
  0x9e   :  { %1325 = vmatpush1.bf16.msra.mxu1 %v2152_v56  ;;  %v2230_v56 = vld [vmem:[#allocation5 + $0x260] ss:$8 sps:$4 sm:$0xff]  }
  0x9f   :  { %1454 = vmatpush1.bf16.msra.mxu0 %v2155_v57  ;;  %1326 = vmatprep.subr.bf16.mxu1 %v2160_v58  ;;  %v2233_v57 = vld [vmem:[#allocation5 + $0x560] ss:$8 sps:$4 sm:$0xff]   ;;  %v2238_v58 = vld [vmem:[#allocation5 + $0x274] ss:$8 sps:$4 sm:$0xff]  }
  0xa0   :  { %1455 = vmatprep.subr.bf16.mxu0 %v2163_v59  ;;  %v2241_v59 = vld [vmem:[#allocation5 + $0x574] ss:$8 sps:$4 sm:$0xff]  }
  0xa2   :  { %1327 = vmatpush1.bf16.msra.mxu1 %v2158_v60  ;;  %v2236_v60 = vld [vmem:[#allocation5 + $0x270] ss:$8 sps:$4 sm:$0xff]  }
  0xa3   :  { %1456 = vmatpush1.bf16.msra.mxu0 %v2161_v61  ;;  %1328 = vmatprep.subr.bf16.mxu1 %v2166_v62  ;;  %v2239_v61 = vld [vmem:[#allocation5 + $0x570] ss:$8 sps:$4 sm:$0xff]   ;;  %v2244_v62 = vld [vmem:[#allocation5 + $0x284] ss:$8 sps:$4 sm:$0xff]  }
  0xa4   :  { %1457 = vmatprep.subr.bf16.mxu0 %v2169_v63  ;;  %v2247_v63 = vld [vmem:[#allocation5 + $0x584] ss:$8 sps:$4 sm:$0xff]  }
  0xa6   :  { %1329 = vmatpush1.bf16.msra.mxu1 %v2164_v0  ;;  %v2242_v0 = vld [vmem:[#allocation5 + $0x280] ss:$8 sps:$4 sm:$0xff]  }
  0xa7   :  { %1458 = vmatpush1.bf16.msra.mxu0 %v2167_v1  ;;  %1330 = vmatprep.subr.bf16.mxu1 %v2172_v2  ;;  %v2245_v1 = vld [vmem:[#allocation5 + $0x580] ss:$8 sps:$4 sm:$0xff]   ;;  %v2250_v2 = vld [vmem:[#allocation5 + $0x294] ss:$8 sps:$4 sm:$0xff]  }
  0xa8   :  { %1459 = vmatprep.subr.bf16.mxu0 %v2175_v3  ;;  %v2253_v3 = vld [vmem:[#allocation5 + $0x594] ss:$8 sps:$4 sm:$0xff]  }
  0xaa   :  { %1331 = vmatpush1.bf16.msra.mxu1 %v2170_v4  ;;  %v2248_v4 = vld [vmem:[#allocation5 + $0x290] ss:$8 sps:$4 sm:$0xff]  }
  0xab   :  { %1460 = vmatpush1.bf16.msra.mxu0 %v2173_v5  ;;  %1332 = vmatprep.subr.bf16.mxu1 %v2178_v6  ;;  %v2251_v5 = vld [vmem:[#allocation5 + $0x590] ss:$8 sps:$4 sm:$0xff]   ;;  %v2256_v6 = vld [vmem:[#allocation5 + $0x2a4] ss:$8 sps:$4 sm:$0xff]  }
  0xac   :  { %1461 = vmatprep.subr.bf16.mxu0 %v2181_v7  ;;  %v2259_v7 = vld [vmem:[#allocation5 + $0x5a4] ss:$8 sps:$4 sm:$0xff]  }
  0xae   :  { %1333 = vmatpush1.bf16.msra.mxu1 %v2176_v8  ;;  %v2254_v8 = vld [vmem:[#allocation5 + $0x2a0] ss:$8 sps:$4 sm:$0xff]  }
  0xaf   :  { %1462 = vmatpush1.bf16.msra.mxu0 %v2179_v9  ;;  %1334 = vmatprep.subr.bf16.mxu1 %v2184_v10  ;;  %v2257_v9 = vld [vmem:[#allocation5 + $0x5a0] ss:$8 sps:$4 sm:$0xff]   ;;  %v2262_v10 = vld [vmem:[#allocation5 + $0x2b4] ss:$8 sps:$4 sm:$0xff]  }
  0xb0   :  { %1463 = vmatprep.subr.bf16.mxu0 %v2187_v11  ;;  %v2265_v11 = vld [vmem:[#allocation5 + $0x5b4] ss:$8 sps:$4 sm:$0xff]  }
  0xb2   :  { %1335 = vmatpush1.bf16.msra.mxu1 %v2182_v12  ;;  %v2260_v12 = vld [vmem:[#allocation5 + $0x2b0] ss:$8 sps:$4 sm:$0xff]  }
  0xb3   :  { %1464 = vmatpush1.bf16.msra.mxu0 %v2185_v13  ;;  %1336 = vmatprep.subr.bf16.mxu1 %v2190_v14  ;;  %v2263_v13 = vld [vmem:[#allocation5 + $0x5b0] ss:$8 sps:$4 sm:$0xff]   ;;  %v2268_v14 = vld [vmem:[#allocation5 + $0x2c4] ss:$8 sps:$4 sm:$0xff]  }
  0xb4   :  { %1465 = vmatprep.subr.bf16.mxu0 %v2193_v15  ;;  %v2271_v15 = vld [vmem:[#allocation5 + $0x5c4] ss:$8 sps:$4 sm:$0xff]  }
  0xb6   :  { %1337 = vmatpush1.bf16.msra.mxu1 %v2188_v16  ;;  %v2266_v16 = vld [vmem:[#allocation5 + $0x2c0] ss:$8 sps:$4 sm:$0xff]  }
  0xb7   :  { %1466 = vmatpush1.bf16.msra.mxu0 %v2191_v17  ;;  %1349 = vmatprep.subr.bf16.mxu1 %v2196_v19  ;;  %v2269_v17 = vld [vmem:[#allocation5 + $0x5c0] ss:$8 sps:$4 sm:$0xff]   ;;  %v2277_v19 = vld [vmem:[#allocation5 + $0x5d4] ss:$8 sps:$4 sm:$0xff]  }
  0xb8   :  { %1478 = vmatprep.subr.bf16.mxu0 %v2199_v23  ;;  %v2283_v23 = vld [vmem:[#allocation5 + $0x5e4] ss:$8 sps:$4 sm:$0xff]  }
  0xb9   :  { %1339 = vmatmul.mubr.bf16.vlgmr.msra.gmra.mrb[0].mxu1 %v89_v26  ;;  %v2286_v26 = vld [vmem:[#allocation5 + $0x2f4] ss:$8 sps:$4 sm:$0xff]  }
  0xba   :  { %1468 = vmatmul.mubr.bf16.vlgmr.msra.gmra.mrb[0].mxu0 %v95_v27  ;;  %1350 = vmatpush1.bf16.msra.mxu1 %v2194_v24  ;;  %v2278_v24 = vld [vmem:[#allocation5 + $0x2e0] ss:$8 sps:$4 sm:$0xff]   ;;  %v2289_v27 = vld [vmem:[#allocation5 + $0x5f4] ss:$8 sps:$4 sm:$0xff]  }
  0xbb   :  { %1479 = vmatpush1.bf16.msra.mxu0 %v2197_v25  ;;  %1351 = vmatprep.subr.bf16.mxu1 %v2202_v28  ;;  %v2281_v25 = vld [vmem:[#allocation5 + $0x5e0] ss:$8 sps:$4 sm:$0xff]   ;;  %v2284_v28 = vld [vmem:[#allocation5 + $0x2f0] ss:$8 sps:$4 sm:$0xff]  }
  0xbc   :  { %1480 = vmatprep.subr.bf16.mxu0 %v2205_v29  ;;  %1381 = vmatprep.mubr.bf16.mxu1 %v92_v36  ;;  %v2287_v29 = vld [vmem:[#allocation5 + $0x5f0] ss:$8 sps:$4 sm:$0xff]  }
  0xbd   :  { %1510 = vmatprep.mubr.bf16.mxu0 %v98_v41  ;;  %v2295_v41 = vld [vmem:[#allocation7 + $0x10] sm:$0xff]  }
  0xbe   :  { %1352 = vmatpush1.bf16.msra.mxu1 %v2200_v30  ;;  %v67_v30 = vld [vmem:[#allocation2 + $0x20] sm:$0xff] }
  0xbf   :  { %1481 = vmatpush1.bf16.msra.mxu0 %v2203_v31  ;;  %1353 = vmatprep.subr.bf16.mxu1 %v2208_v32  ;;  %v79_v31 = vld [vmem:[#allocation2 + $0x80] sm:$0xff]  ;;  %v73_v32 = vld [vmem:[#allocation2 + $0x50] sm:$0xff] }
  0xc0   :  { %1482 = vmatprep.subr.bf16.mxu0 %v2211_v33  ;;  %v85_v33 = vld [vmem:[#allocation2 + $0xb0] sm:$0xff]  ;;  %v91_v35 = vpack.c.bf16 %v79_v31, %v67_v30 }
  0xc1   :  { %v97_v36 = vpack.c.bf16 %v85_v33, %v73_v32 }
  0xc2   :  { %1354 = vmatpush1.bf16.msra.mxu1 %v2206_v39  ;;  %v2293_v39 = vld [vmem:[#allocation7 + $0x8] sm:$0xff]  }
  0xc3   :  { %1483 = vmatpush1.bf16.msra.mxu0 %v2209_v40  ;;  %1355 = vmatprep.subr.bf16.mxu1 %v2214_v42  ;;  %v2294_v40 = vld [vmem:[#allocation7 + $0x50] sm:$0xff]   ;;  %v2296_v42 = vld [vmem:[#allocation7 + $0x58] sm:$0xff]  }
  0xc4   :  { %1484 = vmatprep.subr.bf16.mxu0 %v2217_v43  ;;  %v2297_v43 = vld [vmem:[#allocation7 + $0x18] sm:$0xff]  }
  0xc6   :  { %1356 = vmatpush1.bf16.msra.mxu1 %v2212_v44  ;;  %v2298_v44 = vld [vmem:[#allocation7 + $0x60] sm:$0xff]  }
  0xc7   :  { %1485 = vmatpush1.bf16.msra.mxu0 %v2215_v45  ;;  %1357 = vmatprep.subr.bf16.mxu1 %v2220_v46  ;;  %v2299_v45 = vld [vmem:[#allocation7 + $0x20] sm:$0xff]   ;;  %v2300_v46 = vld [vmem:[#allocation7 + $0x68] sm:$0xff]  }
  0xc8   :  { %1486 = vmatprep.subr.bf16.mxu0 %v2223_v47  ;;  %v2301_v47 = vld [vmem:[#allocation7 + $0x28] sm:$0xff]  }
  0xca   :  { %1358 = vmatpush1.bf16.msra.mxu1 %v2218_v48  ;;  %v2302_v48 = vld [vmem:[#allocation7 + $0x70] sm:$0xff]  }
  0xcb   :  { %1487 = vmatpush1.bf16.msra.mxu0 %v2221_v49  ;;  %1359 = vmatprep.subr.bf16.mxu1 %v2226_v50  ;;  %v2303_v49 = vld [vmem:[#allocation7 + $0x30] sm:$0xff]   ;;  %v2304_v50 = vld [vmem:[#allocation7 + $0x78] sm:$0xff]  }
  0xcc   :  { %1488 = vmatprep.subr.bf16.mxu0 %v2229_v51  ;;  %v2305_v51 = vld [vmem:[#allocation7 + $0x38] sm:$0xff]  }
  0xce   :  { %1360 = vmatpush1.bf16.msra.mxu1 %v2224_v52  ;;  %v293_v52 = vlaneseq }
  0xcf   :  { %1489 = vmatpush1.bf16.msra.mxu0 %v2227_v53  ;;  %1361 = vmatprep.subr.bf16.mxu1 %v2232_v54 }
  0xd0   :  { %1490 = vmatprep.subr.bf16.mxu0 %v2235_v55  ;;  %v294_v53 = vshrl.u32 %v293_v52, 7  ;;  %v291_v55 = vld [vmem:[%s2510_s2] sm:$0x3] }
  0xd2   :  { %1362 = vmatpush1.bf16.msra.mxu1 %v2230_v56  ;;  %v295_v54 = vsub.s32 0, %v294_v53  ;;  %v299_v56 = vsub.s32 1, %v294_v53 }
  0xd3   :  { %1491 = vmatpush1.bf16.msra.mxu0 %v2233_v57  ;;  %1363 = vmatprep.subr.bf16.mxu1 %v2238_v58 }
  0xd4   :  { %1492 = vmatprep.subr.bf16.mxu0 %v2241_v59  ;;  %v296_v57 = vrot.slane %v291_v55, %v295_v54  ;;  %v300_v58 = vrot.slane %v291_v55, %v299_v56 }
  0xd6   :  { %1364 = vmatpush1.bf16.msra.mxu1 %v2236_v60 }
  0xd7   :  { %1493 = vmatpush1.bf16.msra.mxu0 %v2239_v61  ;;  %1365 = vmatprep.subr.bf16.mxu1 %v2244_v62 }
  0xd8   :  { %1494 = vmatprep.subr.bf16.mxu0 %v2247_v63 }
  0xda   :  { %1366 = vmatpush1.bf16.msra.mxu1 %v2242_v0 }
  0xdb   :  { %1495 = vmatpush1.bf16.msra.mxu0 %v2245_v1  ;;  %1367 = vmatprep.subr.bf16.mxu1 %v2250_v2 }
  0xdc   :  { %1496 = vmatprep.subr.bf16.mxu0 %v2253_v3 }
  0xde   :  { %1368 = vmatpush1.bf16.msra.mxu1 %v2248_v4 }
  0xdf   :  { %1497 = vmatpush1.bf16.msra.mxu0 %v2251_v5  ;;  %1369 = vmatprep.subr.bf16.mxu1 %v2256_v6 }
  0xe0   :  { %1498 = vmatprep.subr.bf16.mxu0 %v2259_v7 }
  0xe2   :  { %1370 = vmatpush1.bf16.msra.mxu1 %v2254_v8 }
  0xe3   :  { %1499 = vmatpush1.bf16.msra.mxu0 %v2257_v9  ;;  %1371 = vmatprep.subr.bf16.mxu1 %v2262_v10 }
  0xe4   :  { %1500 = vmatprep.subr.bf16.mxu0 %v2265_v11 }
  0xe6   :  { %1372 = vmatpush1.bf16.msra.mxu1 %v2260_v12 }
  0xe7   :  { %1501 = vmatpush1.bf16.msra.mxu0 %v2263_v13  ;;  %1373 = vmatprep.subr.bf16.mxu1 %v2268_v14 }
  0xe8   :  { %1502 = vmatprep.subr.bf16.mxu0 %v2271_v15 }
  0xea   :  { %1374 = vmatpush1.bf16.msra.mxu1 %v2266_v16 }
  0xeb   :  { %1503 = vmatpush1.bf16.msra.mxu0 %v2269_v17  ;;  %1375 = vmatprep.subr.bf16.mxu1 %v2274_v18  ;;  %v1927_v18 = vld [vmem:[%s2512_s4] ss:$0 sm:$0xff]  ;;  %s2380_s4 = scalar_lea.vmem %s1723_s13, 256 }
  0xec   :  { %1504 = vmatprep.subr.bf16.mxu0 %v2277_v19  ;;  %p2381_p10 = scmp.ne.s32.totalorder %s1723_s13, %s2380_s4  ;;  %p2386_p12 = scmp.lt.s32.totalorder %s2380_s4, %s2380_s4 }
  0xee   :  { %1376 = vmatpush1.bf16.msra.mxu1 %v2272_v20  ;;  %p2387_p13 = por %p2386_p12, %p2385_p11 }
  0xef   :  { %1505 = vmatpush1.bf16.msra.mxu0 %v2275_v21  ;;  %1377 = vmatprep.subr.bf16.mxu1 %v2280_v22 }
  0xf0   :  { %1506 = vmatprep.subr.bf16.mxu0 %v2283_v23  ;;  %p2388_p0 = pnand %p2387_p13, %p2381_p10 }
  0xf2   :  { %1378 = vmatpush1.bf16.msra.mxu1 %v2278_v24 }
  0xf3   :  { %1507 = vmatpush1.bf16.msra.mxu0 %v2281_v25  ;;  %1379 = vmatprep.subr.bf16.mxu1 %v2286_v26 }
  0xf4   :  { %1508 = vmatprep.subr.bf16.mxu0 %v2289_v27 }
  0xf6   :  { %1380 = vmatpush1.bf16.msra.mxu1 %v2284_v28 }
  0xf7   :  { %1509 = vmatpush1.bf16.msra.mxu0 %v2287_v29  ;;  %1946 = vmatprep.subr.bf16.mxu1 %v2290_v34 }
  0xf9   :  { %1382 = vmatmul.mubr.bf16.vlgmr.msra.gmra.mrb[0].mxu1 %v91_v35 }
  0xfa   :  { %1511 = vmatmul.mubr.bf16.vlgmr.msra.gmra.mrb[0].mxu0 %v97_v36  ;;  %1947 = vmatpush3.bf16.msra.mxu1 %v2291_v37 }
  0xfb   :  { %1948 = vmatprep.subr.bf16.mxu1 %v2292_v38 }
  0xfe   :  { %1949 = vmatpush3.bf16.msra.mxu1 %v2293_v39 }
  0xff   :  { %1950 = vmatprep.subr.bf16.mxu1 %v2294_v40 }
 0x102   :  { %1951 = vmatpush3.bf16.msra.mxu1 %v2295_v41 }
 0x103   :  { %1952 = vmatprep.subr.bf16.mxu1 %v2296_v42 }
 0x106   :  { %1953 = vmatpush3.bf16.msra.mxu1 %v2297_v43 }
 0x107   :  { %1954 = vmatprep.subr.bf16.mxu1 %v2298_v44 }
 0x10a   :  { %1955 = vmatpush3.bf16.msra.mxu1 %v2299_v45 }
 0x10b   :  { %1956 = vmatprep.subr.bf16.mxu1 %v2300_v46 }
 0x10e   :  { %1957 = vmatpush3.bf16.msra.mxu1 %v2301_v47 }
 0x10f   :  { %1958 = vmatprep.subr.bf16.mxu1 %v2302_v48 }
 0x112   :  { %1959 = vmatpush3.bf16.msra.mxu1 %v2303_v49 }
 0x113   :  { %1960 = vmatprep.subr.bf16.mxu1 %v2304_v50 }
 0x116   :  { %1961 = vmatpush3.bf16.msra.mxu1 %v2305_v51 }
 0x1cc   :  { %v1383_v59 = vpop.f32.mrb[0].mxu1 }
 0x1cd   :  { %v1512_v60 = vpop.f32.mrb[0].mxu0  ;;  %v1968_v61 = vadd.f32 %v1383_v59, %v296_v57  ;;  %v1385_v62 = vpop.f32.mrb[1].mxu1 }
 0x1ce   :  { %v1514_v63 = vpop.f32.mrb[1].mxu0  ;;  %v1970_v0 = vadd.f32 %v1385_v62, %v300_v58  ;;  %v1387_v1 = vpop.f32.mrb[2].mxu1 }
 0x1cf   :  { %v1516_v2 = vpop.f32.mrb[2].mxu0  ;;  %v1969_v3 = vadd.f32 %v1968_v61, %v1512_v60  ;;  %v1972_v4 = vadd.f32 %v1387_v1, %v296_v57  ;;  %v1389_v5 = vpop.f32.mrb[3].mxu1 }
 0x1d0   :  { %v1518_v6 = vpop.f32.mrb[3].mxu0  ;;  %v1971_v7 = vadd.f32 %v1970_v0, %v1514_v63  ;;  %v1974_v8 = vadd.f32 %v1389_v5, %v300_v58 }
 0x1d1   :  { %v1973_v9 = vadd.f32 %v1972_v4, %v1516_v2  ;;  %v1521_v11 = vmax.f32 %v1969_v3, 0.0 }
 0x1d2   :  { %v1975_v10 = vadd.f32 %v1974_v8, %v1518_v6  ;;  %v1522_v13 = vmax.f32 %v1971_v7, 0.0 }
 0x1d3   :  { %v1523_v12 = vmax.f32 %v1973_v9, 0.0 }
 0x1d4   :  { %v1524_v14 = vmax.f32 %v1975_v10, 0.0 }
 0x1d5   :  { %v1525_v15 = vpack.c.bf16 %v1523_v12, %v1521_v11 }
 0x1d6   :  { %v1526_v16 = vpack.c.bf16 %v1524_v14, %v1522_v13 }
 0x1d8   :  { %1694 = vmatprep.mubr.bf16.mxu1 %v1526_v16 }
 0x1d9   :  { %1695 = vmatmul.mubr.bf16.vlgmr.msra.gmra.mrb[4].mxu1 %v1525_v15 }
 0x2ac   :  { %v1962_v17 = vpop.f32.mrb[4].mxu1 }
 0x2ad   :  { %v1963_v19 = vpop.f32.mrb[5].mxu1 }
 0x2ae   :  { %v1964_v20 = vadd.f32 %v1963_v19, %v1962_v17  ;;  %v1965_v21 = vpop.f32.mrb[6].mxu1 }
 0x2af   :  { %v1966_v22 = vpop.f32.mrb[7].mxu1 }
 0x2b0   :  { %v1697_v23 = vadd.f32 %v1964_v20, %v1927_v18  ;;  %v1967_v24 = vadd.f32 %v1966_v22, %v1965_v21 }
 0x2b2   :  { %v1944_v25 = vmul.f32 -1.442695, %v1697_v23  ;;  %v1700_v26 = vadd.f32 %v1967_v24, %v1927_v18 }
 0x2b4   :  { %2306 = vpow2.f32 %v1944_v25  ;;  %v1945_v27 = vmul.f32 -1.442695, %v1700_v26 }
 0x2b6   :  { %2308 = vpow2.f32 %v1945_v27 }
 0x2be   :  { %v2307_v28 = vpop.eup %2306 }
 0x2bf   :  { %v1709_v29 = vadd.f32 1.0, %v2307_v28 }
 0x2c0   :  { %v2309_v30 = vpop.eup %2308 }
 0x2c1   :  { %2310 = vrcp.f32 %v1709_v29  ;;  %v1710_v31 = vadd.f32 1.0, %v2309_v30 }
 0x2c3   :  { %2312 = vrcp.f32 %v1710_v31 }
 0x2cb   :  { %v2311_v32 = vpop.eup %2310 }
 0x2cc   :  { %1715 = vst [vmem:[#allocation8] sm:$0xff] %v2311_v32 }
 0x2cd   :  { %v2313_v33 = vpop.eup %2312 }
 0x2ce   :  { %1716 = vst [vmem:[#allocation8 + $0x8] sm:$0xff] %v2313_v33 }
 0x2cf   :  { %2391 = shalt.err (!%p2388_p0)
}
 0x2d0   :  { %s2392_s16 = scalar_lea.hbm %s2513_s5, 256 }
 0x2d1   :  { %p2393_p1 = scmp.ne.s32.totalorder %s2513_s5, %s2392_s16  ;;  %p2396_p2 = scmp.lt.u32.totalorder %s2392_s16, %s2513_s5 }
 0x2d3   :  { %p2398_p3 = pnand %p2396_p2, %p2393_p1 }
 0x2d5   :  { %2401 = shalt.err (!%p2398_p3)
}
 0x2d6   :  { %1728 = dma.vmem_to_hbm [thread:$0]  %s1723_s13, 256, %s2513_s5, [#allocation4], %s2409_s28, %s2409_s28, %s2410_s29  }
 0x2d7   :  { %2406 = dma.done.wait [#allocation4], 256  }
 0x2d8   :  { %2407 = vsyncadd [#allocation4], 4294967040 }
 0x2d9   :  { %1732 = vsyncpa [#allocation3], 1 }
 0x2da   :  { %1733 = vsyncpa [#allocation6], 1 }
 0x2db   :  { %1734 = vsyncpa [#allocation4], 1 }

</bundles_post_ra>
